<compile_context>
chip_gen: v5e
topology: v5e:2x2
jax: 0.10.0
libtpu: 0.0.40
codegen_flags: <defaults>
</compile_context>

<pallas_src>
import numpy as np
import jax
import jax.numpy as jnp
from jax.experimental import pallas as pl
from jax.experimental.pallas import tpu as pltpu


def _round_up(x, m):
    return ((x + m - 1) // m) * m


def _pad2d(a, rows, cols):
    return jnp.pad(a, ((0, rows - a.shape[0]), (0, cols - a.shape[1])))


# ---------------------------------------------------------------------------
# Pallas kernel: one batch tile of the full CDAE forward
# ---------------------------------------------------------------------------
def cdae_kernel(
    x_ref, y_ref, hu_ref,
    ex_w1, ex_w2, ey_w1, ey_w2,          # encoder matmul weights (bf16)
    dx_w1, dx_w2, dy_w1, dy_w2,          # decoder matmul weights (bf16)
    be_ref,                              # packed (8, E_p) f32 biases
    dxb2_ref, dyb2_ref,                  # (1, NM_p) / (1, NB_p) f32 biases
    w_ref, wt_ref,                       # orthogonal W and W^T (bf16)
    preds_x_ref, preds_y_ref, preds_x2y_ref, preds_y2x_ref,   # bf16 outputs
    feat_x_ref, feat_y_ref,                                    # f32 outputs
    reg_ref,                                                   # (TB, 128) f32
):
    f32 = jnp.float32
    bf16 = jnp.bfloat16

    def mm(a, w):
        # bf16 MXU matmul with f32 accumulation
        return jnp.dot(a.astype(bf16), w[...], preferred_element_type=f32)

    b_e = be_ref[...]                    # (8, E_p) f32
    # packed bias rows: 0=ex_b1 1=ex_b2 2=ey_b1 3=ey_b2 4=dx_b1 5=dy_b1

    def lin_e(a, w, row):
        return mm(a, w) + b_e[row:row + 1, :]

    # TODO(synk): nn.Dropout is treated as identity (inference / eval mode).
    x = x_ref[...]                       # bf16 (0/1 values -> exact)
    y = y_ref[...]

    # encoders: Linear -> ReLU -> Linear
    h_x = lin_e(jax.nn.relu(lin_e(x, ex_w1, 0)), ex_w2, 1)
    h_y = lin_e(jax.nn.relu(lin_e(y, ey_w1, 2)), ey_w2, 3)

    h_user = hu_ref[...]                 # f32, gathered in the wrapper
    feat_x = h_x + h_user
    feat_y = h_y + h_user
    feat_x_ref[...] = feat_x
    feat_y_ref[...] = feat_y

    z_x = jax.nn.relu(feat_x)
    z_y = jax.nn.relu(feat_y)

    # orthogonal map (W^T is a separate input -> no in-kernel transpose)
    mzx = mm(z_x, w_ref)                 # z_x @ W
    mzy = mm(z_y, wt_ref)                # z_y @ W.T

    # fused decoders: each decoder runs once on 2*TB rows.  Concatenate in
    # bf16 to halve the live (2*TB, E_p) temporaries.
    tb = z_x.shape[0]
    dec_x_in = jnp.concatenate([z_x.astype(bf16), mzy.astype(bf16)], axis=0)
    dec_y_in = jnp.concatenate([z_y.astype(bf16), mzx.astype(bf16)], axis=0)

    dec_x_out = mm(jax.nn.relu(lin_e(dec_x_in, dx_w1, 4)), dx_w2) + dxb2_ref[...]
    dec_y_out = mm(jax.nn.relu(lin_e(dec_y_in, dy_w1, 5)), dy_w2) + dyb2_ref[...]

    preds_x_ref[...] = dec_x_out[:tb].astype(bf16)
    preds_y2x_ref[...] = dec_x_out[tb:].astype(bf16)
    preds_y_ref[...] = dec_y_out[:tb].astype(bf16)
    preds_x2y_ref[...] = dec_y_out[tb:].astype(bf16)

    # L1 regularization losses (per-row lane reductions, f32 accumulation).
    # Packed lane-dense: lane 0 = reg_x, lane 1 = reg_y, rest zero.
    z_x_ = mm(mzx, wt_ref)
    z_y_ = mm(mzy, w_ref)
    reg_x = jnp.sum(jnp.abs(z_x - z_x_), axis=1, keepdims=True)   # (TB, 1)
    reg_y = jnp.sum(jnp.abs(z_y - z_y_), axis=1, keepdims=True)   # (TB, 1)
    lane = jax.lax.broadcasted_iota(jnp.int32, reg_ref.shape, 1)
    reg_ref[...] = (jnp.where(lane == 0, reg_x, 0.0)
                    + jnp.where(lane == 1, reg_y, 0.0))


# ---------------------------------------------------------------------------
# Tile-size heuristic: biggest batch tile that fits the VMEM budget
# ---------------------------------------------------------------------------
def _pick_batch_tile(B, nm_p, nb_p, e_p, weight_bytes, vmem_budget, vmem_cap):
    # bytes that scale with the batch tile:
    #   double-buffered tiled inputs (x/y bf16, h_user f32) and outputs
    #   (4 bf16 preds, 2 f32 features, packed f32 reg), plus live in-kernel
    #   activations (decoder path runs on 2*TB rows).
    io_row = 2 * ((2 * nm_p + 2 * nb_p + 4 * e_p)                 # inputs
                  + (4 * nm_p + 4 * nb_p + 8 * e_p + 512))        # outputs
    act_row = 4 * 18 * e_p + 10 * (nm_p + nb_p)                   # live temps
    per_row = io_row + act_row

    reserve = 4 << 20                    # Mosaic internal scratch headroom
    avail = max(vmem_budget - weight_bytes - reserve, 2 << 20)
    tb = int(avail // per_row)

    cap = 1024 if vmem_cap >= (96 << 20) else 512   # smaller cap on v7x
    tb = max(16, min(cap, tb))
    tb = (tb // 16) * 16                 # multiple of 16 -> bf16 sublane tiling

    # megacore: keep at least 2 grid steps when the batch allows it
    if B > 16:
        tb = min(tb, _round_up((B + 1) // 2, 16))
    tb = min(tb, _round_up(B, 16))
    return max(tb, 16)


# ---------------------------------------------------------------------------
# Wrapper: padding, bf16 weight prep, grid/BlockSpecs, output slicing
# ---------------------------------------------------------------------------
def cdae_forward(params, batch_user, batch_user_x, batch_user_y):
    f32, bf16 = jnp.float32, jnp.bfloat16
    B, NM = batch_user_x.shape
    NB = batch_user_y.shape[1]
    E = params["emb"].shape[1]

    NM_p = _round_up(NM, 128)
    NB_p = _round_up(NB, 128)
    E_p = _round_up(E, 128)

    # VMEM budget: v7x has 64 MiB per TensorCore, v5e/v6e 128 MiB.
    try:
        vmem_cap = int(pltpu.get_tpu_info().vmem_capacity_bytes)
    except Exception:
        vmem_cap = 64 << 20
    vmem_limit = int(min(vmem_cap * 3 // 4, 100 << 20))

    def pw(a, r, c):                      # padded bf16 matmul weight
        return _pad2d(a.astype(f32), r, c).astype(bf16)

    def pb(a, c):                         # padded f32 bias, shape (1, c)
        return _pad2d(a.astype(f32).reshape(1, -1), 1, c)

    w_p = _pad2d(params["orthogonal_w"].astype(f32), E_p, E_p)

    # six E_p-wide biases packed into one (8, E_p) buffer (rows 6/7 zero)
    be = jnp.concatenate([
        pb(params["ex_b1"], E_p), pb(params["ex_b2"], E_p),
        pb(params["ey_b1"], E_p), pb(params["ey_b2"], E_p),
        pb(params["dx_b1"], E_p), pb(params["dy_b1"], E_p),
        jnp.zeros((2, E_p), f32),
    ], axis=0)

    weights = (
        pw(params["ex_w1"], NM_p, E_p), pw(params["ex_w2"], E_p, E_p),
        pw(params["ey_w1"], NB_p, E_p), pw(params["ey_w2"], E_p, E_p),
        pw(params["dx_w1"], E_p, E_p), pw(params["dx_w2"], E_p, NM_p),
        pw(params["dy_w1"], E_p, E_p), pw(params["dy_w2"], E_p, NB_p),
        be,
        pb(params["dx_b2"], NM_p), pb(params["dy_b2"], NB_p),
        w_p.astype(bf16), w_p.T.astype(bf16),
    )
    # resident weights are single-buffered (Buffered(1)) -> count 1x
    weight_bytes = sum(int(np.prod(w.shape)) * w.dtype.itemsize for w in weights)

    TB = _pick_batch_tile(B, NM_p, NB_p, E_p, weight_bytes, vmem_limit, vmem_cap)
    B_p = _round_up(B, TB)
    grid = (B_p // TB,)

    # user-embedding lookup: plain XLA gather (keeps the user table out of VMEM)
    uid = batch_user.astype(jnp.int32)
    h_user = jnp.take(params["emb"].astype(f32), uid, axis=0)

    x_p = _pad2d(batch_user_x.astype(f32), B_p, NM_p).astype(bf16)
    y_p = _pad2d(batch_user_y.astype(f32), B_p, NB_p).astype(bf16)
    hu_p = _pad2d(h_user, B_p, E_p)

    def row_spec(cols):                   # batch-tiled, default double-buffered
        return pl.BlockSpec((TB, cols), lambda i: (i, 0))

    def resident(shape):                  # weights: same block every step
        return pl.BlockSpec(shape, lambda i: (0, 0),
                            pipeline_mode=pl.Buffered(1))

    in_specs = [row_spec(NM_p), row_spec(NB_p), row_spec(E_p)]
    in_specs += [resident(w.shape) for w in weights]

    out_specs = [
        row_spec(NM_p), row_spec(NB_p), row_spec(NB_p), row_spec(NM_p),
        row_spec(E_p), row_spec(E_p),
        row_spec(128),                    # packed reg output (lane-dense)
    ]

    out_shape = (
        jax.ShapeDtypeStruct((B_p, NM_p), bf16),   # preds_x
        jax.ShapeDtypeStruct((B_p, NB_p), bf16),   # preds_y
        jax.ShapeDtypeStruct((B_p, NB_p), bf16),   # preds_x2y
        jax.ShapeDtypeStruct((B_p, NM_p), bf16),   # preds_y2x
        jax.ShapeDtypeStruct((B_p, E_p), f32),     # feature_x
        jax.ShapeDtypeStruct((B_p, E_p), f32),     # feature_y
        jax.ShapeDtypeStruct((B_p, 128), f32),     # packed reg losses
    )

    outs = pl.pallas_call(
        cdae_kernel,
        grid=grid,
        in_specs=in_specs,
        out_specs=out_specs,
        out_shape=out_shape,
        compiler_params=pltpu.CompilerParams(
            dimension_semantics=("parallel",),
            vmem_limit_bytes=vmem_limit,
        ),
    )(x_p, y_p, hu_p, *weights)

    px, py, px2y, py2x, fx, fy, reg = outs
    return (px[:B, :NM], py[:B, :NB], px2y[:B, :NB], py2x[:B, :NM],
            fx[:B, :E], fy[:B, :E], reg[:B, 0], reg[:B, 1])


cdae_forward = jax.jit(cdae_forward)


# ---------------------------------------------------------------------------
# Deterministic parameter init (shapes per CDAE.__init__, weights pre-
# transposed to (in, out))
# ---------------------------------------------------------------------------
def init_params(key, NUM_USER, NUM_MOVIE, NUM_BOOK, E):
    ks = list(jax.random.split(key, 10))

    def linear_init(k, fan_in, fan_out):
        kw, kb = jax.random.split(k)
        bound = 1.0 / np.sqrt(fan_in)
        w = jax.random.uniform(kw, (fan_in, fan_out), jnp.float32, -bound, bound)
        b = jax.random.uniform(kb, (1, fan_out), jnp.float32, -bound, bound)
        return w, b

    params = {}
    params["emb"] = 0.01 * jax.random.normal(ks[0], (NUM_USER, E), jnp.float32)

    params["ex_w1"], params["ex_b1"] = linear_init(ks[1], NUM_MOVIE, E)
    params["ex_w2"], params["ex_b2"] = linear_init(ks[2], E, E)
    params["ey_w1"], params["ey_b1"] = linear_init(ks[3], NUM_BOOK, E)
    params["ey_w2"], params["ey_b2"] = linear_init(ks[4], E, E)

    params["dx_w1"], params["dx_b1"] = linear_init(ks[5], E, E)
    params["dx_w2"], params["dx_b2"] = linear_init(ks[6], E, NUM_MOVIE)
    params["dy_w1"], params["dy_b1"] = linear_init(ks[7], E, E)
    params["dy_w2"], params["dy_b2"] = linear_init(ks[8], E, NUM_BOOK)

    gain = np.sqrt(2.0)
    bound = gain * np.sqrt(6.0 / (E + E))
    params["orthogonal_w"] = jax.random.uniform(
        ks[9], (E, E), jnp.float32, -bound, bound)
    return params


# ---------------------------------------------------------------------------
# Plain-JAX references (dropout = identity). `dot` selects the precision.
# ---------------------------------------------------------------------------
def _dot_bf16(a, b):
    return jnp.dot(a.astype(jnp.bfloat16), b.astype(jnp.bfloat16),
                   preferred_element_type=jnp.float32)


def _dot_f32(a, b):
    return jnp.dot(a, b, preferred_element_type=jnp.float32,
                   precision=jax.lax.Precision.HIGHEST)


def cdae_reference(p, batch_user, x, y, dot):
    def lin(v, w, b):
        return dot(v, w) + b

    h_x = lin(jax.nn.relu(lin(x, p["ex_w1"], p["ex_b1"])), p["ex_w2"], p["ex_b2"])
    h_y = lin(jax.nn.relu(lin(y, p["ey_w1"], p["ey_b1"])), p["ey_w2"], p["ey_b2"])
    h_user = p["emb"][batch_user]
    feat_x = h_x + h_user
    feat_y = h_y + h_user
    z_x = jax.nn.relu(feat_x)
    z_y = jax.nn.relu(feat_y)

    def dec_x(v):
        return lin(jax.nn.relu(lin(v, p["dx_w1"], p["dx_b1"])), p["dx_w2"], p["dx_b2"])

    def dec_y(v):
        return lin(jax.nn.relu(lin(v, p["dy_w1"], p["dy_b1"])), p["dy_w2"], p["dy_b2"])

    W = p["orthogonal_w"]
    mzx, mzy = dot(z_x, W), dot(z_y, W.T)
    z_x_, z_y_ = dot(mzx, W.T), dot(mzy, W)
    return (dec_x(z_x), dec_y(z_y), dec_y(mzx), dec_x(mzy), feat_x, feat_y,
            jnp.sum(jnp.abs(z_x - z_x_), axis=1),
            jnp.sum(jnp.abs(z_y - z_y_), axis=1))


if __name__ == "__main__":
    NUM_USER, NUM_MOVIE, NUM_BOOK, EMBED_SIZE = 16, 256, 128, 32
    B = 8

    key = jax.random.PRNGKey(0)
    k_p, k_u, k_x, k_y = jax.random.split(key, 4)

    params = init_params(k_p, NUM_USER, NUM_MOVIE, NUM_BOOK, EMBED_SIZE)
    batch_user = jax.random.randint(k_u, (B,), 0, NUM_USER, jnp.int32)
    batch_user_x = (jax.random.uniform(k_x, (B, NUM_MOVIE)) < 0.3).astype(jnp.float32)
    batch_user_y = (jax.random.uniform(k_y, (B, NUM_BOOK)) < 0.3).astype(jnp.float32)

    outs = jax.block_until_ready(
        cdae_forward(params, batch_user, batch_user_x, batch_user_y))

    names = ["preds_x", "preds_y", "preds_x2y", "preds_y2x",
             "feature_x", "feature_y", "z_x_reg_loss", "z_y_reg_loss"]
    # preds are stored in bf16 -> wider tolerance; f32 outputs stay tight.
    tols = [1e-2, 1e-2, 1e-2, 1e-2, 2e-3, 2e-3, 2e-3, 2e-3]

    def as_f32(a):
        return np.asarray(jnp.asarray(a, jnp.float32))

    # tight check vs. a reference using the same mixed precision
    # (bf16 matmul operands, f32 accumulation)
    refs_bf16 = cdae_reference(params, batch_user, batch_user_x, batch_user_y,
                               _dot_bf16)
    for n, o, r, t in zip(names, outs, refs_bf16, tols):
        assert o.shape == r.shape, (n, o.shape, r.shape)
        np.testing.assert_allclose(as_f32(o), as_f32(r),
                                   rtol=t, atol=t, err_msg=n)

    # loose sanity check vs. the full-f32 reference (bf16 rounding bound)
    refs_f32 = cdae_reference(params, batch_user, batch_user_x, batch_user_y,
                              _dot_f32)
    for n, o, r in zip(names, outs, refs_f32):
        np.testing.assert_allclose(as_f32(o), as_f32(r),
                                   rtol=5e-2, atol=5e-2, err_msg=n)

    print("KERNEL_OK")
</pallas_src>

<mosaic_0001>
module attributes {stable_mosaic.version = 11 : i64} {
  func.func @cdae_kernel(%arg0: i32, %arg1: memref<16x256xbf16, #tpu.memory_space<vmem>>, %arg2: memref<16x128xbf16, #tpu.memory_space<vmem>>, %arg3: memref<16x128xf32, #tpu.memory_space<vmem>>, %arg4: memref<256x128xbf16, #tpu.memory_space<vmem>>, %arg5: memref<128x128xbf16, #tpu.memory_space<vmem>>, %arg6: memref<128x128xbf16, #tpu.memory_space<vmem>>, %arg7: memref<128x128xbf16, #tpu.memory_space<vmem>>, %arg8: memref<128x128xbf16, #tpu.memory_space<vmem>>, %arg9: memref<128x256xbf16, #tpu.memory_space<vmem>>, %arg10: memref<128x128xbf16, #tpu.memory_space<vmem>>, %arg11: memref<128x128xbf16, #tpu.memory_space<vmem>>, %arg12: memref<8x128xf32, #tpu.memory_space<vmem>>, %arg13: memref<1x256xf32, #tpu.memory_space<vmem>>, %arg14: memref<1x128xf32, #tpu.memory_space<vmem>>, %arg15: memref<128x128xbf16, #tpu.memory_space<vmem>>, %arg16: memref<128x128xbf16, #tpu.memory_space<vmem>>, %arg17: memref<16x256xbf16, #tpu.memory_space<vmem>>, %arg18: memref<16x128xbf16, #tpu.memory_space<vmem>>, %arg19: memref<16x128xbf16, #tpu.memory_space<vmem>>, %arg20: memref<16x256xbf16, #tpu.memory_space<vmem>>, %arg21: memref<16x128xf32, #tpu.memory_space<vmem>>, %arg22: memref<16x128xf32, #tpu.memory_space<vmem>>, %arg23: memref<16x128xf32, #tpu.memory_space<vmem>>) attributes {dimension_semantics = [#tpu.dimension_semantics<parallel>], iteration_bounds = array<i64: 1>, scalar_prefetch = 0 : i64, scratch_operands = 0 : i64, tpu.core_type = #tpu.core_type<tc>, window_params = [{transform_indices = @transform_0, window_bounds = array<i64: 16, 256>}, {transform_indices = @transform_1, window_bounds = array<i64: 16, 128>}, {transform_indices = @transform_2, window_bounds = array<i64: 16, 128>}, {pipeline_mode = #tpu.pipeline_mode<synchronous>, transform_indices = @transform_3, window_bounds = array<i64: 256, 128>}, {pipeline_mode = #tpu.pipeline_mode<synchronous>, transform_indices = @transform_4, window_bounds = array<i64: 128, 128>}, {pipeline_mode = #tpu.pipeline_mode<synchronous>, transform_indices = @transform_5, window_bounds = array<i64: 128, 128>}, {pipeline_mode = #tpu.pipeline_mode<synchronous>, transform_indices = @transform_6, window_bounds = array<i64: 128, 128>}, {pipeline_mode = #tpu.pipeline_mode<synchronous>, transform_indices = @transform_7, window_bounds = array<i64: 128, 128>}, {pipeline_mode = #tpu.pipeline_mode<synchronous>, transform_indices = @transform_8, window_bounds = array<i64: 128, 256>}, {pipeline_mode = #tpu.pipeline_mode<synchronous>, transform_indices = @transform_9, window_bounds = array<i64: 128, 128>}, {pipeline_mode = #tpu.pipeline_mode<synchronous>, transform_indices = @transform_10, window_bounds = array<i64: 128, 128>}, {pipeline_mode = #tpu.pipeline_mode<synchronous>, transform_indices = @transform_11, window_bounds = array<i64: 8, 128>}, {pipeline_mode = #tpu.pipeline_mode<synchronous>, transform_indices = @transform_12, window_bounds = array<i64: 1, 256>}, {pipeline_mode = #tpu.pipeline_mode<synchronous>, transform_indices = @transform_13, window_bounds = array<i64: 1, 128>}, {pipeline_mode = #tpu.pipeline_mode<synchronous>, transform_indices = @transform_14, window_bounds = array<i64: 128, 128>}, {pipeline_mode = #tpu.pipeline_mode<synchronous>, transform_indices = @transform_15, window_bounds = array<i64: 128, 128>}, {transform_indices = @transform_16, window_bounds = array<i64: 16, 256>}, {transform_indices = @transform_17, window_bounds = array<i64: 16, 128>}, {transform_indices = @transform_18, window_bounds = array<i64: 16, 128>}, {transform_indices = @transform_19, window_bounds = array<i64: 16, 256>}, {transform_indices = @transform_20, window_bounds = array<i64: 16, 128>}, {transform_indices = @transform_21, window_bounds = array<i64: 16, 128>}, {transform_indices = @transform_22, window_bounds = array<i64: 16, 128>}]} {
    %c0 = arith.constant 0 : index
    %c0_0 = arith.constant 0 : index
    %0 = vector.load %arg12[%c0, %c0_0] : memref<8x128xf32, #tpu.memory_space<vmem>>, vector<8x128xf32>
    %c0_1 = arith.constant 0 : index
    %c0_2 = arith.constant 0 : index
    %1 = vector.load %arg1[%c0_1, %c0_2] : memref<16x256xbf16, #tpu.memory_space<vmem>>, vector<16x256xbf16>
    %c0_3 = arith.constant 0 : index
    %c0_4 = arith.constant 0 : index
    %2 = vector.load %arg2[%c0_3, %c0_4] : memref<16x128xbf16, #tpu.memory_space<vmem>>, vector<16x128xbf16>
    %c0_5 = arith.constant 0 : index
    %c0_6 = arith.constant 0 : index
    %3 = vector.load %arg4[%c0_5, %c0_6] : memref<256x128xbf16, #tpu.memory_space<vmem>>, vector<256x128xbf16>
    %cst = arith.constant dense<0.000000e+00> : vector<16x128xf32>
    %4 = tpu.matmul %1, %3, %cst {dimension_numbers = #tpu.dot_dimension_numbers<[1], [0], [0], [1], [0, 0, 1, 1], [], []>} : vector<16x256xbf16>, vector<256x128xbf16>, vector<16x128xf32> -> vector<16x128xf32>
    %5 = vector.extract_strided_slice %0 {offsets = [0, 0], sizes = [1, 128], strides = [1, 1]} : vector<8x128xf32> to vector<1x128xf32>
    %6 = vector.broadcast %5 : vector<1x128xf32> to vector<16x128xf32>
    %7 = arith.addf %4, %6 : vector<16x128xf32>
    %cst_7 = arith.constant 0.000000e+00 : f32
    %8 = vector.broadcast %cst_7 : f32 to vector<16x128xf32>
    %9 = arith.maximumf %7, %8 : vector<16x128xf32>
    %10 = arith.truncf %9 : vector<16x128xf32> to vector<16x128xbf16>
    %c0_8 = arith.constant 0 : index
    %c0_9 = arith.constant 0 : index
    %11 = vector.load %arg5[%c0_8, %c0_9] : memref<128x128xbf16, #tpu.memory_space<vmem>>, vector<128x128xbf16>
    %cst_10 = arith.constant dense<0.000000e+00> : vector<16x128xf32>
    %12 = tpu.matmul %10, %11, %cst_10 {dimension_numbers = #tpu.dot_dimension_numbers<[1], [0], [0], [1], [0, 0, 1, 1], [], []>} : vector<16x128xbf16>, vector<128x128xbf16>, vector<16x128xf32> -> vector<16x128xf32>
    %13 = vector.extract_strided_slice %0 {offsets = [1, 0], sizes = [1, 128], strides = [1, 1]} : vector<8x128xf32> to vector<1x128xf32>
    %14 = vector.broadcast %13 : vector<1x128xf32> to vector<16x128xf32>
    %15 = arith.addf %12, %14 : vector<16x128xf32>
    %c0_11 = arith.constant 0 : index
    %c0_12 = arith.constant 0 : index
    %16 = vector.load %arg6[%c0_11, %c0_12] : memref<128x128xbf16, #tpu.memory_space<vmem>>, vector<128x128xbf16>
    %cst_13 = arith.constant dense<0.000000e+00> : vector<16x128xf32>
    %17 = tpu.matmul %2, %16, %cst_13 {dimension_numbers = #tpu.dot_dimension_numbers<[1], [0], [0], [1], [0, 0, 1, 1], [], []>} : vector<16x128xbf16>, vector<128x128xbf16>, vector<16x128xf32> -> vector<16x128xf32>
    %18 = vector.extract_strided_slice %0 {offsets = [2, 0], sizes = [1, 128], strides = [1, 1]} : vector<8x128xf32> to vector<1x128xf32>
    %19 = vector.broadcast %18 : vector<1x128xf32> to vector<16x128xf32>
    %20 = arith.addf %17, %19 : vector<16x128xf32>
    %cst_14 = arith.constant 0.000000e+00 : f32
    %21 = vector.broadcast %cst_14 : f32 to vector<16x128xf32>
    %22 = arith.maximumf %20, %21 : vector<16x128xf32>
    %23 = arith.truncf %22 : vector<16x128xf32> to vector<16x128xbf16>
    %c0_15 = arith.constant 0 : index
    %c0_16 = arith.constant 0 : index
    %24 = vector.load %arg7[%c0_15, %c0_16] : memref<128x128xbf16, #tpu.memory_space<vmem>>, vector<128x128xbf16>
    %cst_17 = arith.constant dense<0.000000e+00> : vector<16x128xf32>
    %25 = tpu.matmul %23, %24, %cst_17 {dimension_numbers = #tpu.dot_dimension_numbers<[1], [0], [0], [1], [0, 0, 1, 1], [], []>} : vector<16x128xbf16>, vector<128x128xbf16>, vector<16x128xf32> -> vector<16x128xf32>
    %26 = vector.extract_strided_slice %0 {offsets = [3, 0], sizes = [1, 128], strides = [1, 1]} : vector<8x128xf32> to vector<1x128xf32>
    %27 = vector.broadcast %26 : vector<1x128xf32> to vector<16x128xf32>
    %28 = arith.addf %25, %27 : vector<16x128xf32>
    %c0_18 = arith.constant 0 : index
    %c0_19 = arith.constant 0 : index
    %29 = vector.load %arg3[%c0_18, %c0_19] : memref<16x128xf32, #tpu.memory_space<vmem>>, vector<16x128xf32>
    %30 = arith.addf %15, %29 : vector<16x128xf32>
    %31 = arith.addf %28, %29 : vector<16x128xf32>
    %c0_20 = arith.constant 0 : index
    %c0_21 = arith.constant 0 : index
    %32 = vector.load %arg21[%c0_20, %c0_21] : memref<16x128xf32, #tpu.memory_space<vmem>>, vector<16x128xf32>
    tpu.vector_store %arg21[%c0_20, %c0_21], %30 {strides = array<i32>} : memref<16x128xf32, #tpu.memory_space<vmem>>, vector<16x128xf32>,
    %c0_22 = arith.constant 0 : index
    %c0_23 = arith.constant 0 : index
    %33 = vector.load %arg22[%c0_22, %c0_23] : memref<16x128xf32, #tpu.memory_space<vmem>>, vector<16x128xf32>
    tpu.vector_store %arg22[%c0_22, %c0_23], %31 {strides = array<i32>} : memref<16x128xf32, #tpu.memory_space<vmem>>, vector<16x128xf32>,
    %cst_24 = arith.constant 0.000000e+00 : f32
    %34 = vector.broadcast %cst_24 : f32 to vector<16x128xf32>
    %35 = arith.maximumf %30, %34 : vector<16x128xf32>
    %cst_25 = arith.constant 0.000000e+00 : f32
    %36 = vector.broadcast %cst_25 : f32 to vector<16x128xf32>
    %37 = arith.maximumf %31, %36 : vector<16x128xf32>
    %38 = arith.truncf %35 : vector<16x128xf32> to vector<16x128xbf16>
    %c0_26 = arith.constant 0 : index
    %c0_27 = arith.constant 0 : index
    %39 = vector.load %arg15[%c0_26, %c0_27] : memref<128x128xbf16, #tpu.memory_space<vmem>>, vector<128x128xbf16>
    %cst_28 = arith.constant dense<0.000000e+00> : vector<16x128xf32>
    %40 = tpu.matmul %38, %39, %cst_28 {dimension_numbers = #tpu.dot_dimension_numbers<[1], [0], [0], [1], [0, 0, 1, 1], [], []>} : vector<16x128xbf16>, vector<128x128xbf16>, vector<16x128xf32> -> vector<16x128xf32>
    %41 = arith.truncf %37 : vector<16x128xf32> to vector<16x128xbf16>
    %c0_29 = arith.constant 0 : index
    %c0_30 = arith.constant 0 : index
    %42 = vector.load %arg16[%c0_29, %c0_30] : memref<128x128xbf16, #tpu.memory_space<vmem>>, vector<128x128xbf16>
    %cst_31 = arith.constant dense<0.000000e+00> : vector<16x128xf32>
    %43 = tpu.matmul %41, %42, %cst_31 {dimension_numbers = #tpu.dot_dimension_numbers<[1], [0], [0], [1], [0, 0, 1, 1], [], []>} : vector<16x128xbf16>, vector<128x128xbf16>, vector<16x128xf32> -> vector<16x128xf32>
    %44 = arith.truncf %35 : vector<16x128xf32> to vector<16x128xbf16>
    %45 = arith.truncf %43 : vector<16x128xf32> to vector<16x128xbf16>
    %46 = tpu.concatenate %44, %45 in 0 : vector<16x128xbf16>, vector<16x128xbf16> -> vector<32x128xbf16>
    %47 = arith.truncf %37 : vector<16x128xf32> to vector<16x128xbf16>
    %48 = arith.truncf %40 : vector<16x128xf32> to vector<16x128xbf16>
    %49 = tpu.concatenate %47, %48 in 0 : vector<16x128xbf16>, vector<16x128xbf16> -> vector<32x128xbf16>
    %c0_32 = arith.constant 0 : index
    %c0_33 = arith.constant 0 : index
    %50 = vector.load %arg8[%c0_32, %c0_33] : memref<128x128xbf16, #tpu.memory_space<vmem>>, vector<128x128xbf16>
    %cst_34 = arith.constant dense<0.000000e+00> : vector<32x128xf32>
    %51 = tpu.matmul %46, %50, %cst_34 {dimension_numbers = #tpu.dot_dimension_numbers<[1], [0], [0], [1], [0, 0, 1, 1], [], []>} : vector<32x128xbf16>, vector<128x128xbf16>, vector<32x128xf32> -> vector<32x128xf32>
    %52 = vector.extract_strided_slice %0 {offsets = [4, 0], sizes = [1, 128], strides = [1, 1]} : vector<8x128xf32> to vector<1x128xf32>
    %53 = vector.broadcast %52 : vector<1x128xf32> to vector<32x128xf32>
    %54 = arith.addf %51, %53 : vector<32x128xf32>
    %cst_35 = arith.constant 0.000000e+00 : f32
    %55 = vector.broadcast %cst_35 : f32 to vector<32x128xf32>
    %56 = arith.maximumf %54, %55 : vector<32x128xf32>
    %57 = arith.truncf %56 : vector<32x128xf32> to vector<32x128xbf16>
    %c0_36 = arith.constant 0 : index
    %c0_37 = arith.constant 0 : index
    %58 = vector.load %arg9[%c0_36, %c0_37] : memref<128x256xbf16, #tpu.memory_space<vmem>>, vector<128x256xbf16>
    %cst_38 = arith.constant dense<0.000000e+00> : vector<32x256xf32>
    %59 = tpu.matmul %57, %58, %cst_38 {dimension_numbers = #tpu.dot_dimension_numbers<[1], [0], [0], [1], [0, 0, 1, 1], [], []>} : vector<32x128xbf16>, vector<128x256xbf16>, vector<32x256xf32> -> vector<32x256xf32>
    %c0_39 = arith.constant 0 : index
    %c0_40 = arith.constant 0 : index
    %60 = vector.load %arg13[%c0_39, %c0_40] : memref<1x256xf32, #tpu.memory_space<vmem>>, vector<1x256xf32>
    %61 = vector.broadcast %60 : vector<1x256xf32> to vector<32x256xf32>
    %62 = arith.addf %59, %61 : vector<32x256xf32>
    %c0_41 = arith.constant 0 : index
    %c0_42 = arith.constant 0 : index
    %63 = vector.load %arg10[%c0_41, %c0_42] : memref<128x128xbf16, #tpu.memory_space<vmem>>, vector<128x128xbf16>
    %cst_43 = arith.constant dense<0.000000e+00> : vector<32x128xf32>
    %64 = tpu.matmul %49, %63, %cst_43 {dimension_numbers = #tpu.dot_dimension_numbers<[1], [0], [0], [1], [0, 0, 1, 1], [], []>} : vector<32x128xbf16>, vector<128x128xbf16>, vector<32x128xf32> -> vector<32x128xf32>
    %65 = vector.extract_strided_slice %0 {offsets = [5, 0], sizes = [1, 128], strides = [1, 1]} : vector<8x128xf32> to vector<1x128xf32>
    %66 = vector.broadcast %65 : vector<1x128xf32> to vector<32x128xf32>
    %67 = arith.addf %64, %66 : vector<32x128xf32>
    %cst_44 = arith.constant 0.000000e+00 : f32
    %68 = vector.broadcast %cst_44 : f32 to vector<32x128xf32>
    %69 = arith.maximumf %67, %68 : vector<32x128xf32>
    %70 = arith.truncf %69 : vector<32x128xf32> to vector<32x128xbf16>
    %c0_45 = arith.constant 0 : index
    %c0_46 = arith.constant 0 : index
    %71 = vector.load %arg11[%c0_45, %c0_46] : memref<128x128xbf16, #tpu.memory_space<vmem>>, vector<128x128xbf16>
    %cst_47 = arith.constant dense<0.000000e+00> : vector<32x128xf32>
    %72 = tpu.matmul %70, %71, %cst_47 {dimension_numbers = #tpu.dot_dimension_numbers<[1], [0], [0], [1], [0, 0, 1, 1], [], []>} : vector<32x128xbf16>, vector<128x128xbf16>, vector<32x128xf32> -> vector<32x128xf32>
    %c0_48 = arith.constant 0 : index
    %c0_49 = arith.constant 0 : index
    %73 = vector.load %arg14[%c0_48, %c0_49] : memref<1x128xf32, #tpu.memory_space<vmem>>, vector<1x128xf32>
    %74 = vector.broadcast %73 : vector<1x128xf32> to vector<32x128xf32>
    %75 = arith.addf %72, %74 : vector<32x128xf32>
    %76 = vector.extract_strided_slice %62 {offsets = [0, 0], sizes = [16, 256], strides = [1, 1]} : vector<32x256xf32> to vector<16x256xf32>
    %77 = arith.truncf %76 : vector<16x256xf32> to vector<16x256xbf16>
    %c0_50 = arith.constant 0 : index
    %c0_51 = arith.constant 0 : index
    %78 = vector.load %arg17[%c0_50, %c0_51] : memref<16x256xbf16, #tpu.memory_space<vmem>>, vector<16x256xbf16>
    tpu.vector_store %arg17[%c0_50, %c0_51], %77 {strides = array<i32>} : memref<16x256xbf16, #tpu.memory_space<vmem>>, vector<16x256xbf16>,
    %79 = vector.extract_strided_slice %62 {offsets = [16, 0], sizes = [16, 256], strides = [1, 1]} : vector<32x256xf32> to vector<16x256xf32>
    %80 = arith.truncf %79 : vector<16x256xf32> to vector<16x256xbf16>
    %c0_52 = arith.constant 0 : index
    %c0_53 = arith.constant 0 : index
    %81 = vector.load %arg20[%c0_52, %c0_53] : memref<16x256xbf16, #tpu.memory_space<vmem>>, vector<16x256xbf16>
    tpu.vector_store %arg20[%c0_52, %c0_53], %80 {strides = array<i32>} : memref<16x256xbf16, #tpu.memory_space<vmem>>, vector<16x256xbf16>,
    %82 = vector.extract_strided_slice %75 {offsets = [0, 0], sizes = [16, 128], strides = [1, 1]} : vector<32x128xf32> to vector<16x128xf32>
    %83 = arith.truncf %82 : vector<16x128xf32> to vector<16x128xbf16>
    %c0_54 = arith.constant 0 : index
    %c0_55 = arith.constant 0 : index
    %84 = vector.load %arg18[%c0_54, %c0_55] : memref<16x128xbf16, #tpu.memory_space<vmem>>, vector<16x128xbf16>
    tpu.vector_store %arg18[%c0_54, %c0_55], %83 {strides = array<i32>} : memref<16x128xbf16, #tpu.memory_space<vmem>>, vector<16x128xbf16>,
    %85 = vector.extract_strided_slice %75 {offsets = [16, 0], sizes = [16, 128], strides = [1, 1]} : vector<32x128xf32> to vector<16x128xf32>
    %86 = arith.truncf %85 : vector<16x128xf32> to vector<16x128xbf16>
    %c0_56 = arith.constant 0 : index
    %c0_57 = arith.constant 0 : index
    %87 = vector.load %arg19[%c0_56, %c0_57] : memref<16x128xbf16, #tpu.memory_space<vmem>>, vector<16x128xbf16>
    tpu.vector_store %arg19[%c0_56, %c0_57], %86 {strides = array<i32>} : memref<16x128xbf16, #tpu.memory_space<vmem>>, vector<16x128xbf16>,
    %88 = arith.truncf %40 : vector<16x128xf32> to vector<16x128xbf16>
    %c0_58 = arith.constant 0 : index
    %c0_59 = arith.constant 0 : index
    %89 = vector.load %arg16[%c0_58, %c0_59] : memref<128x128xbf16, #tpu.memory_space<vmem>>, vector<128x128xbf16>
    %cst_60 = arith.constant dense<0.000000e+00> : vector<16x128xf32>
    %90 = tpu.matmul %88, %89, %cst_60 {dimension_numbers = #tpu.dot_dimension_numbers<[1], [0], [0], [1], [0, 0, 1, 1], [], []>} : vector<16x128xbf16>, vector<128x128xbf16>, vector<16x128xf32> -> vector<16x128xf32>
    %91 = arith.truncf %43 : vector<16x128xf32> to vector<16x128xbf16>
    %c0_61 = arith.constant 0 : index
    %c0_62 = arith.constant 0 : index
    %92 = vector.load %arg15[%c0_61, %c0_62] : memref<128x128xbf16, #tpu.memory_space<vmem>>, vector<128x128xbf16>
    %cst_63 = arith.constant dense<0.000000e+00> : vector<16x128xf32>
    %93 = tpu.matmul %91, %92, %cst_63 {dimension_numbers = #tpu.dot_dimension_numbers<[1], [0], [0], [1], [0, 0, 1, 1], [], []>} : vector<16x128xbf16>, vector<128x128xbf16>, vector<16x128xf32> -> vector<16x128xf32>
    %94 = arith.subf %35, %90 : vector<16x128xf32>
    %95 = math.absf %94 : vector<16x128xf32>
    %cst_64 = arith.constant dense<0.000000e+00> : vector<16xf32>
    %96 = vector.multi_reduction <add>, %95, %cst_64 [1] : vector<16x128xf32> to vector<16xf32>
    %97 = vector.shape_cast %96 : vector<16xf32> to vector<16x1xf32>
    %98 = arith.subf %37, %93 : vector<16x128xf32>
    %99 = math.absf %98 : vector<16x128xf32>
    %cst_65 = arith.constant dense<0.000000e+00> : vector<16xf32>
    %100 = vector.multi_reduction <add>, %99, %cst_65 [1] : vector<16x128xf32> to vector<16xf32>
    %101 = vector.shape_cast %100 : vector<16xf32> to vector<16x1xf32>
    %102 = tpu.iota {dimensions = array<i32: 1>} : vector<16x128xi32>
    %c0_i32 = arith.constant 0 : i32
    %103 = vector.broadcast %c0_i32 : i32 to vector<16x128xi32>
    %104 = arith.cmpi eq, %102, %103 : vector<16x128xi32>
    %cst_66 = arith.constant 0.000000e+00 : f32
    %105 = vector.shape_cast %97 : vector<16x1xf32> to vector<16x1xf32>
    %106 = vector.broadcast %105 : vector<16x1xf32> to vector<16x128xf32>
    %107 = vector.broadcast %cst_66 : f32 to vector<16x128xf32>
    %108 = arith.select %104, %106, %107 : vector<16x128xi1>, vector<16x128xf32>
    %c1_i32 = arith.constant 1 : i32
    %109 = vector.broadcast %c1_i32 : i32 to vector<16x128xi32>
    %110 = arith.cmpi eq, %102, %109 : vector<16x128xi32>
    %cst_67 = arith.constant 0.000000e+00 : f32
    %111 = vector.shape_cast %101 : vector<16x1xf32> to vector<16x1xf32>
    %112 = vector.broadcast %111 : vector<16x1xf32> to vector<16x128xf32>
    %113 = vector.broadcast %cst_67 : f32 to vector<16x128xf32>
    %114 = arith.select %110, %112, %113 : vector<16x128xi1>, vector<16x128xf32>
    %115 = arith.addf %108, %114 : vector<16x128xf32>
    %c0_68 = arith.constant 0 : index
    %c0_69 = arith.constant 0 : index
    %116 = vector.load %arg23[%c0_68, %c0_69] : memref<16x128xf32, #tpu.memory_space<vmem>>, vector<16x128xf32>
    tpu.vector_store %arg23[%c0_68, %c0_69], %115 {strides = array<i32>} : memref<16x128xf32, #tpu.memory_space<vmem>>, vector<16x128xf32>,
    return
  }
  func.func @transform_0(%arg0: i32) -> (i32, i32) {
    %c0_i32 = arith.constant 0 : i32
    %c0_i32_0 = arith.constant 0 : i32
    return %arg0, %c0_i32 : i32, i32
  }
  func.func @transform_1(%arg0: i32) -> (i32, i32) {
    %c0_i32 = arith.constant 0 : i32
    %c0_i32_0 = arith.constant 0 : i32
    return %arg0, %c0_i32 : i32, i32
  }
  func.func @transform_2(%arg0: i32) -> (i32, i32) {
    %c0_i32 = arith.constant 0 : i32
    %c0_i32_0 = arith.constant 0 : i32
    return %arg0, %c0_i32 : i32, i32
  }
  func.func @transform_3(%arg0: i32) -> (i32, i32) {
    %c0_i32 = arith.constant 0 : i32
    %c0_i32_0 = arith.constant 0 : i32
    %c0_i32_1 = arith.constant 0 : i32
    return %c0_i32, %c0_i32_0 : i32, i32
  }
  func.func @transform_4(%arg0: i32) -> (i32, i32) {
    %c0_i32 = arith.constant 0 : i32
    %c0_i32_0 = arith.constant 0 : i32
    %c0_i32_1 = arith.constant 0 : i32
    return %c0_i32, %c0_i32_0 : i32, i32
  }
  func.func @transform_5(%arg0: i32) -> (i32, i32) {
    %c0_i32 = arith.constant 0 : i32
    %c0_i32_0 = arith.constant 0 : i32
    %c0_i32_1 = arith.constant 0 : i32
    return %c0_i32, %c0_i32_0 : i32, i32
  }
  func.func @transform_6(%arg0: i32) -> (i32, i32) {
    %c0_i32 = arith.constant 0 : i32
    %c0_i32_0 = arith.constant 0 : i32
    %c0_i32_1 = arith.constant 0 : i32
    return %c0_i32, %c0_i32_0 : i32, i32
  }
  func.func @transform_7(%arg0: i32) -> (i32, i32) {
    %c0_i32 = arith.constant 0 : i32
    %c0_i32_0 = arith.constant 0 : i32
    %c0_i32_1 = arith.constant 0 : i32
    return %c0_i32, %c0_i32_0 : i32, i32
  }
  func.func @transform_8(%arg0: i32) -> (i32, i32) {
    %c0_i32 = arith.constant 0 : i32
    %c0_i32_0 = arith.constant 0 : i32
    %c0_i32_1 = arith.constant 0 : i32
    return %c0_i32, %c0_i32_0 : i32, i32
  }
  func.func @transform_9(%arg0: i32) -> (i32, i32) {
    %c0_i32 = arith.constant 0 : i32
    %c0_i32_0 = arith.constant 0 : i32
    %c0_i32_1 = arith.constant 0 : i32
    return %c0_i32, %c0_i32_0 : i32, i32
  }
  func.func @transform_10(%arg0: i32) -> (i32, i32) {
    %c0_i32 = arith.constant 0 : i32
    %c0_i32_0 = arith.constant 0 : i32
    %c0_i32_1 = arith.constant 0 : i32
    return %c0_i32, %c0_i32_0 : i32, i32
  }
  func.func @transform_11(%arg0: i32) -> (i32, i32) {
    %c0_i32 = arith.constant 0 : i32
    %c0_i32_0 = arith.constant 0 : i32
    %c0_i32_1 = arith.constant 0 : i32
    return %c0_i32, %c0_i32_0 : i32, i32
  }
  func.func @transform_12(%arg0: i32) -> (i32, i32) {
    %c0_i32 = arith.constant 0 : i32
    %c0_i32_0 = arith.constant 0 : i32
    %c0_i32_1 = arith.constant 0 : i32
    return %c0_i32, %c0_i32_0 : i32, i32
  }
  func.func @transform_13(%arg0: i32) -> (i32, i32) {
    %c0_i32 = arith.constant 0 : i32
    %c0_i32_0 = arith.constant 0 : i32
    %c0_i32_1 = arith.constant 0 : i32
    return %c0_i32, %c0_i32_0 : i32, i32
  }
  func.func @transform_14(%arg0: i32) -> (i32, i32) {
    %c0_i32 = arith.constant 0 : i32
    %c0_i32_0 = arith.constant 0 : i32
    %c0_i32_1 = arith.constant 0 : i32
    return %c0_i32, %c0_i32_0 : i32, i32
  }
  func.func @transform_15(%arg0: i32) -> (i32, i32) {
    %c0_i32 = arith.constant 0 : i32
    %c0_i32_0 = arith.constant 0 : i32
    %c0_i32_1 = arith.constant 0 : i32
    return %c0_i32, %c0_i32_0 : i32, i32
  }
  func.func @transform_16(%arg0: i32) -> (i32, i32) {
    %c0_i32 = arith.constant 0 : i32
    %c0_i32_0 = arith.constant 0 : i32
    return %arg0, %c0_i32 : i32, i32
  }
  func.func @transform_17(%arg0: i32) -> (i32, i32) {
    %c0_i32 = arith.constant 0 : i32
    %c0_i32_0 = arith.constant 0 : i32
    return %arg0, %c0_i32 : i32, i32
  }
  func.func @transform_18(%arg0: i32) -> (i32, i32) {
    %c0_i32 = arith.constant 0 : i32
    %c0_i32_0 = arith.constant 0 : i32
    return %arg0, %c0_i32 : i32, i32
  }
  func.func @transform_19(%arg0: i32) -> (i32, i32) {
    %c0_i32 = arith.constant 0 : i32
    %c0_i32_0 = arith.constant 0 : i32
    return %arg0, %c0_i32 : i32, i32
  }
  func.func @transform_20(%arg0: i32) -> (i32, i32) {
    %c0_i32 = arith.constant 0 : i32
    %c0_i32_0 = arith.constant 0 : i32
    return %arg0, %c0_i32 : i32, i32
  }
  func.func @transform_21(%arg0: i32) -> (i32, i32) {
    %c0_i32 = arith.constant 0 : i32
    %c0_i32_0 = arith.constant 0 : i32
    return %arg0, %c0_i32 : i32, i32
  }
  func.func @transform_22(%arg0: i32) -> (i32, i32) {
    %c0_i32 = arith.constant 0 : i32
    %c0_i32_0 = arith.constant 0 : i32
    return %arg0, %c0_i32 : i32, i32
  }
}

</mosaic_0001>

<bundles_post_ra>
// kernel: cdae_forward.1
= control target key start
LH: loop header
LB: loop body
LE: loop exit
PB: predicated region body
PF: predicated region fallthrough
CT: control target
= control target key end

     0   :  { %s2517_s5 = inlined_call_operand.vmem [shape: bf16[128,128], index: 5, kind: input, shape index: {}]   ;;  %s2518_s3 = inlined_call_operand.vmem [shape: bf16[256,128], index: 3, kind: input, shape index: {}]   ;;  %s2519_s1 = inlined_call_operand.vmem [shape: bf16[16,128], index: 1, kind: input, shape index: {}]   ;;  %s2520_s0 = inlined_call_operand.vmem [shape: bf16[16,256], index: 0, kind: input, shape index: {}]   ;;  %s2521_s6 = inlined_call_operand.vmem [shape: bf16[128,128], index: 6, kind: input, shape index: {}]   ;;  %s2522_s4 = inlined_call_operand.vmem [shape: bf16[128,128], index: 4, kind: input, shape index: {}]   ;;  %s2523_s11 = inlined_call_operand.vmem [shape: f32[8,128], index: 11, kind: input, shape index: {}]   ;;  %s2524_s15 = inlined_call_operand.vmem [shape: bf16[128,128], index: 15, kind: input, shape index: {}]   ;;  %s2525_s9 = inlined_call_operand.vmem [shape: bf16[128,128], index: 9, kind: input, shape index: {}]   ;;  %s2526_s2 = inlined_call_operand.vmem [shape: f32[16,128], index: 2, kind: input, shape index: {}]   ;;  %s2527_s21 = inlined_call_operand.vmem [shape: f32[16,128], index: 21, kind: output, shape index: {5}]   ;;  %s2528_s14 = inlined_call_operand.vmem [shape: bf16[128,128], index: 14, kind: input, shape index: {}]   ;;  %s2529_s7 = inlined_call_operand.vmem [shape: bf16[128,128], index: 7, kind: input, shape index: {}]   ;;  %s2530_s20 = inlined_call_operand.vmem [shape: f32[16,128], index: 20, kind: output, shape index: {4}]   ;;  %s2531_s10 = inlined_call_operand.vmem [shape: bf16[128,128], index: 10, kind: input, shape index: {}]   ;;  %s2532_s8 = inlined_call_operand.vmem [shape: bf16[128,256], index: 8, kind: input, shape index: {}]   ;;  %s2533_s13 = inlined_call_operand.vmem [shape: f32[1,128], index: 13, kind: input, shape index: {}]   ;;  %s2534_s12 = inlined_call_operand.vmem [shape: f32[1,256], index: 12, kind: input, shape index: {}]   ;;  %s2535_s16 = inlined_call_operand.vmem [shape: bf16[16,256], index: 16, kind: output, shape index: {0}]   ;;  %s2536_s17 = inlined_call_operand.vmem [shape: bf16[16,128], index: 17, kind: output, shape index: {1}]   ;;  %s2537_s19 = inlined_call_operand.vmem [shape: bf16[16,256], index: 19, kind: output, shape index: {3}]   ;;  %s2538_s18 = inlined_call_operand.vmem [shape: bf16[16,128], index: 18, kind: output, shape index: {2}]   ;;  %s2539_s22 = inlined_call_operand.vmem [shape: f32[16,128], index: 22, kind: output, shape index: {6}]  }
   0x1   :  { %2545 = sst [smem:[#allocation2_spill]] %s2517_s5 }
   0x2   :  { %2546 = sst [smem:[#allocation3_spill]] %s2518_s3 }
   0x3   :  { %2547 = sst [smem:[#allocation4_spill]] %s2519_s1 }
   0x4   :  { %2548 = sst [smem:[#allocation5_spill]] %s2520_s0 }
   0x5   :  { %2549 = sst [smem:[#allocation6_spill]] %s2521_s6 }
   0x6   :  { %2550 = sst [smem:[#allocation7_spill]] %s2522_s4 }
   0x7   :  { %2551 = sst [smem:[#allocation8_spill]] %s2523_s11 }
   0x8   :  { %s2552_s29 = sld [smem:[#allocation2_spill]] }
   0x9   :  { %s2553_s3 = sld [smem:[#allocation3_spill]] }
   0xa   :  { %s2554_s24 = sld [smem:[#allocation4_spill]] }
   0xb   :  { %s2555_s28 = sld [smem:[#allocation5_spill]] }
   0xc   :  { %s2557_s1 = sld [smem:[#allocation7_spill]] }
   0xd   :  { %s2558_s23 = sld [smem:[#allocation8_spill]] }
   0xe   :  { %v1812_v0 = vld [vmem:[%s2552_s29 + $0x38] sm:$0xff]  ;;  %v1811_v1 = vld [vmem:[%s2552_s29 + $0x30] sm:$0xff]  ;;  %v1810_v6 = vld [vmem:[%s2552_s29 + $0x28] sm:$0xff] }
   0xf   :  { %385 = vmatpush.bf16.msra.mxu3 %v1812_v0  ;;  %v1788_v2 = vld [vmem:[%s2553_s3 + $0x38] sm:$0xff]  ;;  %v1787_v4 = vld [vmem:[%s2553_s3 + $0x30] sm:$0xff]  ;;  %v1786_v7 = vld [vmem:[%s2553_s3 + $0x28] sm:$0xff] }
  0x10   :  { %v1796_v3 = vld [vmem:[%s2553_s3 + $0x78] sm:$0xff]  ;;  %204 = vmatpush.bf16.msra.mxu0 %v1788_v2  ;;  %v1795_v5 = vld [vmem:[%s2553_s3 + $0x70] sm:$0xff]  ;;  %v1794_v8 = vld [vmem:[%s2553_s3 + $0x68] sm:$0xff] }
  0x11   :  { %218 = vmatpush.bf16.msra.mxu1 %v1796_v3  ;;  %v1809_v9 = vld [vmem:[%s2552_s29 + $0x20] sm:$0xff]  ;;  %v1808_v12 = vld [vmem:[%s2552_s29 + $0x18] sm:$0xff]  ;;  %v1807_v15 = vld [vmem:[%s2552_s29 + $0x10] sm:$0xff] }
  0x12   :  { %v1785_v10 = vld [vmem:[%s2553_s3 + $0x20] sm:$0xff]  ;;  %v1784_v13 = vld [vmem:[%s2553_s3 + $0x18] sm:$0xff]  ;;  %v1783_v16 = vld [vmem:[%s2553_s3 + $0x10] sm:$0xff] }
  0x13   :  { %386 = vmatpush.bf16.msra.mxu3 %v1811_v1  ;;  %v1793_v11 = vld [vmem:[%s2553_s3 + $0x60] sm:$0xff]  ;;  %v1792_v14 = vld [vmem:[%s2553_s3 + $0x58] sm:$0xff]  ;;  %v1791_v17 = vld [vmem:[%s2553_s3 + $0x50] sm:$0xff] }
  0x14   :  { %205 = vmatpush.bf16.msra.mxu0 %v1787_v4  ;;  %v1806_v18 = vld [vmem:[%s2552_s29 + $0x8] sm:$0xff]  ;;  %v1805_v21 = vld [vmem:[%s2552_s29] sm:$0xff]  ;;  %v1804_v39 = vld [vmem:[%s2557_s1 + $0x38] sm:$0xff] }
  0x15   :  { %219 = vmatpush.bf16.msra.mxu1 %v1795_v5  ;;  %v1782_v19 = vld [vmem:[%s2553_s3 + $0x8] sm:$0xff]  ;;  %v1780_v22 = vld [vmem:[%s2554_s24] sm:$0xff]  ;;  %300 = vmatpush.bf16.msra.mxu2 %v1804_v39  ;;  %v1803_v40 = vld [vmem:[%s2557_s1 + $0x30] sm:$0xff] }
  0x16   :  { %v1790_v20 = vld [vmem:[%s2553_s3 + $0x48] sm:$0xff]  ;;  %v1781_v23 = vld [vmem:[%s2553_s3] sm:$0xff]  ;;  %v1800_v46 = vld [vmem:[%s2557_s1 + $0x18] sm:$0xff] }
  0x17   :  { %387 = vmatpush.bf16.msra.mxu3 %v1810_v6  ;;  %v1789_v24 = vld [vmem:[%s2553_s3 + $0x40] sm:$0xff]  ;;  %v1779_v26 = vld [vmem:[%s2555_s28 + $0x4] sm:$0xf0]  ;;  %v1322_v28 = vld [vmem:[%s2555_s28 + $0x8] sm:$0xf0]  ;;  %s2556_s3 = sld [smem:[#allocation6_spill]] }
  0x18   :  { %206 = vmatpush.bf16.msra.mxu0 %v1786_v7  ;;  %v1320_v25 = vld [vmem:[%s2555_s28] sm:$0xf]  ;;  %v1778_v27 = vld [vmem:[%s2555_s28 + $0x4] sm:$0xf]  ;;  %v1802_v41 = vld [vmem:[%s2557_s1 + $0x28] sm:$0xff] }
  0x19   :  { %220 = vmatpush.bf16.msra.mxu1 %v1794_v8  ;;  %v1321_v30 = vor.u32 %v1779_v26, %v1320_v25  ;;  %v1325_v31 = vor.u32 %v1778_v27, %v1322_v28  ;;  %301 = vmatpush.bf16.msra.mxu2 %v1803_v40  ;;  %v1801_v42 = vld [vmem:[%s2557_s1 + $0x20] sm:$0xff]  ;;  %v1799_v50 = vld [vmem:[%s2557_s1 + $0x10] sm:$0xff]  ;;  %v1798_v54 = vld [vmem:[%s2557_s1 + $0x8] sm:$0xff] }
  0x1a   :  { %v2145_v43 = vld [vmem:[%s2558_s23] sm:$0xff]  ;;  %v1836_v0 = vld [vmem:[%s2524_s15 + $0x38] sm:$0xff]  ;;  %v1835_v5 = vld [vmem:[%s2524_s15 + $0x30] sm:$0xff] }
  0x1b   :  { %388 = vmatpush.bf16.msra.mxu3 %v1809_v9  ;;  %v97_v44 = vperm.slane %v2145_v43, 0  ;;  %v330_v51 = vperm.slane %v2145_v43, 2  ;;  %v1797_v62 = vld [vmem:[%s2557_s1] sm:$0xff]  ;;  %v1834_v6 = vld [vmem:[%s2524_s15 + $0x28] sm:$0xff]  ;;  %v1832_v8 = vld [vmem:[%s2524_s15 + $0x18] sm:$0xff]  ;;  %v251_v26 = vperm.slane %v2145_v43, 1 }
  0x1c   :  { %207 = vmatpush.bf16.msra.mxu0 %v1785_v10  ;;  %v1833_v7 = vld [vmem:[%s2524_s15 + $0x20] sm:$0xff]  ;;  %v1831_v9 = vld [vmem:[%s2524_s15 + $0x10] sm:$0xff]  ;;  %v1830_v10 = vld [vmem:[%s2524_s15 + $0x8] sm:$0xff] }
  0x1d   :  { %221 = vmatpush.bf16.msra.mxu1 %v1793_v11  ;;  %v1820_v29 = vld [vmem:[%s2556_s3 + $0x38] sm:$0xff]  ;;  %v1819_v32 = vld [vmem:[%s2556_s3 + $0x30] sm:$0xff]  ;;  %v1818_v33 = vld [vmem:[%s2556_s3 + $0x28] sm:$0xff]  ;;  %302 = vmatpush.bf16.msra.mxu2 %v1802_v41 }
  0x1e   :  { %v1817_v34 = vld [vmem:[%s2556_s3 + $0x20] sm:$0xff]  ;;  %v1816_v35 = vld [vmem:[%s2556_s3 + $0x18] sm:$0xff]  ;;  %v1815_v36 = vld [vmem:[%s2556_s3 + $0x10] sm:$0xff] }
  0x1f   :  { %389 = vmatpush.bf16.msra.mxu3 %v1808_v12  ;;  %v1814_v37 = vld [vmem:[%s2556_s3 + $0x8] sm:$0xff]  ;;  %v1813_v38 = vld [vmem:[%s2556_s3] sm:$0xff]  ;;  %v1868_v12 = vld [vmem:[%s2525_s9 + $0x38] sm:$0xff] }
  0x20   :  { %208 = vmatpush.bf16.msra.mxu0 %v1784_v13  ;;  %v1829_v11 = vld [vmem:[%s2524_s15] sm:$0xff]  ;;  %v1867_v13 = vld [vmem:[%s2525_s9 + $0x30] sm:$0xff]  ;;  %v1828_v25 = vld [vmem:[%s2528_s14 + $0x38] sm:$0xff] }
  0x21   :  { %222 = vmatpush.bf16.msra.mxu1 %v1792_v14  ;;  %303 = vmatpush.bf16.msra.mxu2 %v1801_v42  ;;  %v1866_v14 = vld [vmem:[%s2525_s9 + $0x28] sm:$0xff]  ;;  %v1844_v27 = vld [vmem:[%s2529_s7 + $0x38] sm:$0xff]  ;;  %v1827_v28 = vld [vmem:[%s2528_s14 + $0x30] sm:$0xff] }
  0x22   :  { %v1842_v39 = vld [vmem:[%s2529_s7 + $0x28] sm:$0xff] }
  0x23   :  { %390 = vmatpush.bf16.msra.mxu3 %v1807_v15  ;;  %v1865_v15 = vld [vmem:[%s2525_s9 + $0x20] sm:$0xff] }
  0x24   :  { %209 = vmatpush.bf16.msra.mxu0 %v1783_v16  ;;  %v1864_v16 = vld [vmem:[%s2525_s9 + $0x18] sm:$0xff] }
  0x25   :  { %223 = vmatpush.bf16.msra.mxu1 %v1791_v17  ;;  %304 = vmatpush.bf16.msra.mxu2 %v1800_v46  ;;  %v1863_v17 = vld [vmem:[%s2525_s9 + $0x10] sm:$0xff] }
  0x27   :  { %391 = vmatpush.bf16.msra.mxu3 %v1806_v18  ;;  %v1862_v18 = vld [vmem:[%s2525_s9 + $0x8] sm:$0xff] }
  0x28   :  { %210 = vmatpush.bf16.msra.mxu0 %v1782_v19  ;;  %v418_v19 = vperm.slane %v2145_v43, 3 }
  0x29   :  { %224 = vmatpush.bf16.msra.mxu1 %v1790_v20  ;;  %305 = vmatpush.bf16.msra.mxu2 %v1799_v50  ;;  %v1861_v20 = vld [vmem:[%s2525_s9] sm:$0xff] }
  0x2b   :  { %392 = vmatpush.bf16.msra.mxu3 %v1805_v21 }
  0x2c   :  { %211 = vmatpush.bf16.msra.mxu0 %v1781_v23 }
  0x2d   :  { %225 = vmatpush.bf16.msra.mxu1 %v1789_v24  ;;  %306 = vmatpush.bf16.msra.mxu2 %v1798_v54 }
  0x2e   :  { %393 = vmatmul.bf16.vlgmr.msra.gmra.mxu3 %v1780_v22  ;;  %v481_v22 = vld [vmem:[%s2526_s2] sm:$0xff] }
  0x2f   :  { %212 = vmatmul.bf16.vlgmr.msra.gmra.mxu0 %v1321_v30  ;;  %748 = vmatpush.bf16.msrb.mxu3 %v1844_v27  ;;  %v1630_v27 = vld [vmem:[%s2532_s8 + $0x58] sm:$0xf0] }
  0x30   :  { %467 = vmatpush.bf16.msrb.mxu0 %v1820_v29  ;;  %226 = vmatmul.bf16.vlgmr.msra.gmra.mxu1 %v1325_v31  ;;  %v482_v31 = vld [vmem:[%s2526_s2 + $0x8] sm:$0xff] }
  0x31   :  { %307 = vmatpush.bf16.msra.mxu2 %v1797_v62  ;;  %567 = vmatpush.bf16.msrb.mxu1 %v1828_v25  ;;  %v1856_v25 = vld [vmem:[%s2532_s8 + $0x54] sm:$0xf0] }
  0x34   :  { %468 = vmatpush.bf16.msrb.mxu0 %v1819_v32 }
  0x35   :  { %653 = vmatpush.bf16.msrb.mxu2 %v1836_v0  ;;  %568 = vmatpush.bf16.msrb.mxu1 %v1827_v28  ;;  %v1821_v0 = vld [vmem:[%s2528_s14] sm:$0xff] }
  0x38   :  { %469 = vmatpush.bf16.msrb.mxu0 %v1818_v33  ;;  %v1843_v33 = vld [vmem:[%s2529_s7 + $0x30] sm:$0xff] }
  0x39   :  { %654 = vmatpush.bf16.msrb.mxu2 %v1835_v5  ;;  %749 = vmatpush.bf16.msrb.mxu3 %v1843_v33  ;;  %v1874_v5 = vld [vmem:[%s2531_s10 + $0x28] sm:$0xff] }
  0x3c   :  { %470 = vmatpush.bf16.msrb.mxu0 %v1817_v34 }
  0x3d   :  { %655 = vmatpush.bf16.msrb.mxu2 %v1834_v6  ;;  %750 = vmatpush.bf16.msrb.mxu3 %v1842_v39  ;;  %v1873_v6 = vld [vmem:[%s2531_s10 + $0x20] sm:$0xff] }
  0x40   :  { %471 = vmatpush.bf16.msrb.mxu0 %v1816_v35 }
  0x41   :  { %656 = vmatpush.bf16.msrb.mxu2 %v1833_v7  ;;  %v1872_v7 = vld [vmem:[%s2531_s10 + $0x18] sm:$0xff] }
  0x44   :  { %472 = vmatpush.bf16.msrb.mxu0 %v1815_v36 }
  0x45   :  { %657 = vmatpush.bf16.msrb.mxu2 %v1832_v8  ;;  %v1871_v8 = vld [vmem:[%s2531_s10 + $0x10] sm:$0xff] }
  0x48   :  { %473 = vmatpush.bf16.msrb.mxu0 %v1814_v37 }
  0x49   :  { %658 = vmatpush.bf16.msrb.mxu2 %v1831_v9  ;;  %v1870_v9 = vld [vmem:[%s2531_s10 + $0x8] sm:$0xff] }
  0x4c   :  { %474 = vmatpush.bf16.msrb.mxu0 %v1813_v38  ;;  %v1826_v38 = vld [vmem:[%s2528_s14 + $0x28] sm:$0xff] }
  0x4d   :  { %659 = vmatpush.bf16.msrb.mxu2 %v1830_v10  ;;  %569 = vmatpush.bf16.msrb.mxu1 %v1826_v38  ;;  %v1869_v10 = vld [vmem:[%s2531_s10] sm:$0xff] }
  0x51   :  { %660 = vmatpush.bf16.msrb.mxu2 %v1829_v11  ;;  %v1644_v11 = vld [vmem:[%s2532_s8 + $0x70] sm:$0xf] }
  0xac   :  { %v213_v45 = vpop.f32.mrf.mxu0 }
  0xad   :  { %v227_v47 = vpop.f32.mrf.mxu1  ;;  %v214_v49 = vadd.f32 %v213_v45, %v97_v44 }
  0xaf   :  { %v228_v52 = vadd.f32 %v227_v47, %v214_v49  ;;  %v1841_v47 = vld [vmem:[%s2529_s7 + $0x20] sm:$0xff] }
  0xb0   :  { %751 = vmatpush.bf16.msrb.mxu3 %v1841_v47  ;;  %v1851_v47 = vld [vmem:[%s2532_s8 + $0x34] sm:$0xf] }
  0xb1   :  { %v394_v48 = vpop.f32.mrf.mxu3  ;;  %v232_v59 = vmax.f32 %v228_v52, 0.0  ;;  %v1824_v52 = vld [vmem:[%s2528_s14 + $0x18] sm:$0xff] }
  0xb2   :  { %v395_v57 = vadd.f32 %v394_v48, %v330_v51 }
  0xb4   :  { %v215_v53 = vpop.f32.mrf.mxu0  ;;  %v399_v1 = vmax.f32 %v395_v57, 0.0  ;;  %v1839_v57 = vld [vmem:[%s2529_s7 + $0x10] sm:$0xff] }
  0xb5   :  { %v216_v55 = vadd.f32 %v215_v53, %v97_v44  ;;  %v229_v56 = vpop.f32.mrf.mxu1  ;;  %v1825_v44 = vld [vmem:[%s2528_s14 + $0x20] sm:$0xff]  ;;  %v1840_v53 = vld [vmem:[%s2529_s7 + $0x18] sm:$0xff] }
  0xb6   :  { %570 = vmatpush.bf16.msrb.mxu1 %v1825_v44  ;;  %752 = vmatpush.bf16.msrb.mxu3 %v1840_v53  ;;  %v1850_v53 = vld [vmem:[%s2532_s8 + $0x24] sm:$0xf0] }
  0xb7   :  { %v230_v60 = vadd.f32 %v229_v56, %v216_v55  ;;  %v1823_v56 = vld [vmem:[%s2528_s14 + $0x10] sm:$0xff] }
  0xb9   :  { %v396_v58 = vpop.f32.mrf.mxu3  ;;  %v233_v63 = vmax.f32 %v230_v60, 0.0  ;;  %v1822_v60 = vld [vmem:[%s2528_s14 + $0x8] sm:$0xff] }
  0xba   :  { %v397_v61 = vadd.f32 %v396_v58, %v330_v51  ;;  %571 = vmatpush.bf16.msrb.mxu1 %v1824_v52  ;;  %753 = vmatpush.bf16.msrb.mxu3 %v1839_v57  ;;  %v1604_v52 = vld [vmem:[%s2532_s8 + $0x20] sm:$0xf] }
  0xbb   :  { %v234_v3 = vpack.c.bf16 %v233_v63, %v232_v59 }
  0xbc   :  { %v400_v2 = vmax.f32 %v397_v61, 0.0  ;;  %v1838_v61 = vld [vmem:[%s2529_s7 + $0x8] sm:$0xff] }
  0xbd   :  { %308 = vmatmul.bf16.vlgmr.msra.gmra.mxu2 %v234_v3  ;;  %v1876_v3 = vld [vmem:[%s2531_s10 + $0x38] sm:$0xff] }
  0xbe   :  { %v401_v4 = vpack.c.bf16 %v400_v2, %v399_v1  ;;  %978 = vmatpush.bf16.msra.mxu2 %v1868_v12  ;;  %572 = vmatpush.bf16.msrb.mxu1 %v1823_v56  ;;  %v1837_v1 = vld [vmem:[%s2529_s7] sm:$0xff]  ;;  %v1860_v12 = vld [vmem:[%s2532_s8 + $0x74] sm:$0xf0] }
  0xbf   :  { %754 = vmatpush.bf16.msrb.mxu3 %v1838_v61  ;;  %v1605_v61 = vor.u32 %v1850_v53, %v1604_v52 }
  0xc0   :  { %475 = vmatmul.bf16.vlgmr.msrb.gmra.mxu0 %v401_v4  ;;  %v1875_v4 = vld [vmem:[%s2531_s10 + $0x30] sm:$0xff] }
  0xc2   :  { %979 = vmatpush.bf16.msra.mxu2 %v1867_v13  ;;  %573 = vmatpush.bf16.msrb.mxu1 %v1822_v60  ;;  %v1859_v13 = vld [vmem:[%s2532_s8 + $0x74] sm:$0xf] }
  0xc3   :  { %755 = vmatpush.bf16.msrb.mxu3 %v1837_v1 }
  0xc6   :  { %980 = vmatpush.bf16.msra.mxu2 %v1866_v14  ;;  %574 = vmatpush.bf16.msrb.mxu1 %v1821_v0  ;;  %v2396_v0 = vperm.slane %v2145_v43, 4 }
  0xc7   :  { %1071 = vmatpush.bf16.msra.mxu3 %v1876_v3  ;;  %v1848_v3 = vld [vmem:[%s2532_s8 + $0x14] sm:$0xf0] }
  0xca   :  { %981 = vmatpush.bf16.msra.mxu2 %v1865_v15  ;;  %v1645_v15 = vor.u32 %v1860_v12, %v1644_v11 }
  0xcb   :  { %1072 = vmatpush.bf16.msra.mxu3 %v1875_v4 }
  0xcc   :  { %875 = vmatpush.bf16.msra.mxu0 %v1645_v15  ;;  %v1590_v15 = vld [vmem:[%s2532_s8 + $0x8] sm:$0xf0] }
  0xce   :  { %982 = vmatpush.bf16.msra.mxu2 %v1864_v16  ;;  %v1646_v16 = vld [vmem:[%s2532_s8 + $0x78] sm:$0xf0] }
  0xcf   :  { %1073 = vmatpush.bf16.msra.mxu3 %v1874_v5 }
  0xd2   :  { %983 = vmatpush.bf16.msra.mxu2 %v1863_v17  ;;  %v1636_v17 = vld [vmem:[%s2532_s8 + $0x60] sm:$0xf] }
  0xd3   :  { %1074 = vmatpush.bf16.msra.mxu3 %v1873_v6  ;;  %v1847_v6 = vld [vmem:[%s2532_s8 + $0x14] sm:$0xf] }
  0xd6   :  { %984 = vmatpush.bf16.msra.mxu2 %v1862_v18  ;;  %v1858_v18 = vld [vmem:[%s2532_s8 + $0x64] sm:$0xf0] }
  0xd7   :  { %1075 = vmatpush.bf16.msra.mxu3 %v1872_v7 }
  0xda   :  { %985 = vmatpush.bf16.msra.mxu2 %v1861_v20  ;;  %v1857_v20 = vld [vmem:[%s2532_s8 + $0x64] sm:$0xf] }
  0xdb   :  { %1076 = vmatpush.bf16.msra.mxu3 %v1871_v8 }
  0xdf   :  { %1077 = vmatpush.bf16.msra.mxu3 %v1870_v9  ;;  %v1588_v9 = vld [vmem:[%s2532_s8] sm:$0xf] }
  0xe3   :  { %1078 = vmatpush.bf16.msra.mxu3 %v1869_v10 }
 0x13d   :  { %v476_v21 = vpop.f32.mrf.mxu0 }
 0x13e   :  { %v477_v23 = vadd.f32 %v476_v21, %v418_v19  ;;  %v1638_v21 = vld [vmem:[%s2532_s8 + $0x68] sm:$0xf0] }
 0x140   :  { %v485_v24 = vadd.f32 %v481_v22, %v477_v23  ;;  %v309_v29 = vpop.f32.mrf.mxu2  ;;  %v1641_v23 = vor.u32 %v1857_v20, %v1638_v21 }
 0x141   :  { %v310_v32 = vadd.f32 %v309_v29, %v251_v26 }
 0x142   :  { %489 = vst [vmem:[%s2527_s21] sm:$0xff] %v485_v24  ;;  %v2232_v34 = vmax.f32 %v485_v24, 0.0  ;;  %v1628_v24 = vld [vmem:[%s2532_s8 + $0x50] sm:$0xf] }
 0x143   :  { %v483_v36 = vadd.f32 %v481_v22, %v310_v32  ;;  %v1637_v22 = vor.u32 %v1858_v18, %v1636_v17  ;;  %v1629_v28 = vor.u32 %v1856_v25, %v1628_v24  ;;  %v1854_v32 = vld [vmem:[%s2532_s8 + $0x44] sm:$0xf0] }
 0x144   :  { %v581_v41 = vpack.c.bf16 %v2232_v34, %v2232_v34 }
 0x145   :  { %v478_v30 = vpop.f32.mrf.mxu0  ;;  %487 = vst [vmem:[%s2530_s20] sm:$0xff] %v483_v36  ;;  %v2267_v54 = vmax.f32 %v483_v36, 0.0  ;;  %876 = vmatpush.bf16.msra.mxu0 %v1637_v22  ;;  %v1622_v36 = vld [vmem:[%s2532_s8 + $0x48] sm:$0xf0] }
 0x146   :  { %v479_v35 = vadd.f32 %v478_v30, %v418_v19  ;;  %v601_v48 = vunpack.c.l.b16 %v581_v41  ;;  %v1649_v19 = vor.u32 %v1859_v13, %v1646_v16  ;;  %v1846_v13 = vld [vmem:[%s2532_s8 + $0x4] sm:$0xf0] }
 0x147   :  { %v495_v58 = vpack.c.bf16 %v2267_v54, %v2267_v54  ;;  %v1589_v20 = vor.u32 %v1846_v13, %v1588_v9  ;;  %v1903_v9 = vld [vmem:[%s2533_s13] ss:$0 sm:$0xff] }
 0x148   :  { %v486_v37 = vadd.f32 %v482_v31, %v479_v35  ;;  %v311_v45 = vpop.f32.mrf.mxu2  ;;  %894 = vmatpush.bf16.msra.mxu1 %v1649_v19  ;;  %v1853_v35 = vld [vmem:[%s2532_s8 + $0x44] sm:$0xf] }
 0x149   :  { %v312_v46 = vadd.f32 %v311_v45, %v251_v26  ;;  %v515_v62 = vunpack.c.l.b16 %v495_v58  ;;  %v1855_v26 = vld [vmem:[%s2532_s8 + $0x54] sm:$0xf]  ;;  %877 = vmatpush.bf16.msra.mxu0 %v1629_v28  ;;  %v1625_v44 = vor.u32 %v1853_v35, %v1622_v36  ;;  %v1612_v45 = vld [vmem:[%s2532_s8 + $0x30] sm:$0xf]  ;;  %v1849_v58 = vld [vmem:[%s2532_s8 + $0x24] sm:$0xf] }
 0x14a   :  { %490 = vst [vmem:[%s2527_s21 + $0x8] sm:$0xff] %v486_v37  ;;  %v2246_v40 = vmax.f32 %v486_v37, 0.0  ;;  %v1633_v30 = vor.u32 %v1855_v26, %v1630_v27  ;;  %v1884_v26 = vld [vmem:[%s2524_s15 + $0x38] sm:$0xff]  ;;  %v1890_v35 = vld [vmem:[%s2528_s14 + $0x28] sm:$0xff]  ;;  %v1881_v36 = vld [vmem:[%s2524_s15 + $0x20] sm:$0xff] }
 0x14b   :  { %v484_v50 = vadd.f32 %v482_v31, %v312_v46  ;;  %v1620_v31 = vld [vmem:[%s2532_s8 + $0x40] sm:$0xf]  ;;  %v1852_v46 = vld [vmem:[%s2532_s8 + $0x34] sm:$0xf0] }
 0x14c   :  { %v582_v42 = vpack.c.bf16 %v2246_v40, %v2246_v40  ;;  %895 = vmatpush.bf16.msra.mxu1 %v1641_v23  ;;  %v1621_v38 = vor.u32 %v1854_v32, %v1620_v31  ;;  %v1892_v27 = vld [vmem:[%s2528_s14 + $0x38] sm:$0xff]  ;;  %v1883_v31 = vld [vmem:[%s2524_s15 + $0x30] sm:$0xff] }
 0x14d   :  { %488 = vst [vmem:[%s2530_s20 + $0x8] sm:$0xff] %v484_v50  ;;  %v2269_v55 = vmax.f32 %v484_v50, 0.0  ;;  %v1613_v50 = vor.u32 %v1852_v46, %v1612_v45  ;;  %v1891_v32 = vld [vmem:[%s2528_s14 + $0x30] sm:$0xff]  ;;  %v1886_v45 = vld [vmem:[%s2528_s14 + $0x8] sm:$0xff]  ;;  %v1877_v46 = vld [vmem:[%s2524_s15] sm:$0xff] }
 0x14e   :  { %v602_v49 = vunpack.c.l.b16 %v582_v42  ;;  %878 = vmatpush.bf16.msra.mxu0 %v1621_v38  ;;  %v1880_v38 = vld [vmem:[%s2524_s15 + $0x18] sm:$0xff] }
 0x14f   :  { %v496_v59 = vpack.c.bf16 %v2269_v55, %v2269_v55 }
 0x150   :  { %v603_v51 = vpack.c.b16 %v602_v49, %v601_v48  ;;  %896 = vmatpush.bf16.msra.mxu1 %v1633_v30  ;;  %v1614_v48 = vld [vmem:[%s2532_s8 + $0x38] sm:$0xf0] }
 0x151   :  { %v516_v63 = vunpack.c.l.b16 %v496_v59  ;;  %v1606_v59 = vld [vmem:[%s2532_s8 + $0x28] sm:$0xf0] }
 0x152   :  { %661 = vmatmul.bf16.vlgmr.msrb.gmra.mxu2 %v603_v51  ;;  %879 = vmatpush.bf16.msra.mxu0 %v1613_v50  ;;  %v1609_v1 = vor.u32 %v1849_v58, %v1606_v59  ;;  %v789_v50 = vld [vmem:[%s2534_s12] sm:$0x3] }
 0x153   :  { %v517_v2 = vpack.c.b16 %v516_v63, %v515_v62  ;;  %v2393_v62 = vperm.slane %v2145_v43, 5  ;;  %v1598_v43 = vld [vmem:[%s2532_s8 + $0x18] sm:$0xf0] }
 0x154   :  { %897 = vmatpush.bf16.msra.mxu1 %v1625_v44  ;;  %v1601_v12 = vor.u32 %v1847_v6, %v1598_v43  ;;  %v1878_v44 = vld [vmem:[%s2524_s15 + $0x8] sm:$0xff] }
 0x155   :  { %575 = vmatmul.bf16.vlgmr.msrb.gmra.mxu1 %v517_v2  ;;  %756 = vmatmul.bf16.vlgmr.msrb.gmra.mxu3 %v517_v2  ;;  %v1596_v2 = vld [vmem:[%s2532_s8 + $0x10] sm:$0xf] }
 0x156   :  { %880 = vmatpush.bf16.msra.mxu0 %v1605_v61  ;;  %v1597_v8 = vor.u32 %v1848_v3, %v1596_v2 }
 0x15a   :  { %881 = vmatpush.bf16.msra.mxu0 %v1597_v8 }
 0x15e   :  { %882 = vmatpush.bf16.msra.mxu0 %v1589_v20 }
 0x162   :  { %986 = vmatmul.bf16.vlgmr.msra.gmra.mxu2 %v603_v51  ;;  %v1617_v51 = vor.u32 %v1851_v47, %v1614_v48  ;;  %1170 = vmatpush.bf16.msrb.mxu0 %v1884_v26  ;;  %v1885_v47 = vld [vmem:[%s2528_s14] sm:$0xff] }
 0x164   :  { %898 = vmatpush.bf16.msra.mxu1 %v1617_v51 }
 0x166   :  { %1171 = vmatpush.bf16.msrb.mxu0 %v1883_v31 }
 0x168   :  { %899 = vmatpush.bf16.msra.mxu1 %v1609_v1 }
 0x16c   :  { %900 = vmatpush.bf16.msra.mxu1 %v1601_v12 }
 0x1d2   :  { %v576_v42 = vpop.f32.mrf.mxu1 }
 0x1d3   :  { %v675_v57 = vpack.c.bf16 %v576_v42, %v576_v42  ;;  %v1887_v42 = vld [vmem:[%s2528_s14 + $0x10] sm:$0xff] }
 0x1d5   :  { %v662_v14 = vpop.f32.mrf.mxu2  ;;  %v679_v4 = vunpack.c.l.b16 %v675_v57  ;;  %v792_v57 = vperm.slane %v789_v50, 1 }
 0x1d6   :  { %v667_v29 = vpack.c.bf16 %v662_v14, %v662_v14  ;;  %v1845_v14 = vld [vmem:[%s2532_s8 + $0x4] sm:$0xf] }
 0x1d7   :  { %v1593_v21 = vor.u32 %v1845_v14, %v1590_v15 }
 0x1d8   :  { %v671_v39 = vunpack.c.l.b16 %v667_v29  ;;  %v757_v60 = vpop.f32.mrf.mxu3 }
 0x1d9   :  { %v758_v11 = vadd.f32 %v757_v60, %v2396_v0  ;;  %901 = vmatpush.bf16.msra.mxu1 %v1593_v21 }
 0x1da   :  { %v578_v63 = vpop.f32.mrf.mxu1 }
 0x1db   :  { %v676_v5 = vpack.c.bf16 %v578_v63, %v578_v63  ;;  %v767_v24 = vmax.f32 %v758_v11, 0.0 }
 0x1dd   :  { %v664_v33 = vpop.f32.mrf.mxu2  ;;  %v680_v7 = vunpack.c.l.b16 %v676_v5  ;;  %1248 = vmatpush.bf16.msrb.mxu1 %v1892_v27 }
 0x1de   :  { %v668_v37 = vpack.c.bf16 %v664_v33, %v664_v33  ;;  %v1882_v33 = vld [vmem:[%s2524_s15 + $0x28] sm:$0xff] }
 0x1df   :  { %v2424_v17 = vpack.c.b16 %v680_v7, %v679_v4  ;;  %1172 = vmatpush.bf16.msrb.mxu0 %v1882_v33 }
 0x1e0   :  { %v672_v41 = vunpack.c.l.b16 %v668_v37  ;;  %v759_v19 = vpop.f32.mrf.mxu3  ;;  %v1889_v37 = vld [vmem:[%s2528_s14 + $0x20] sm:$0xff] }
 0x1e1   :  { %991 = vmatmul.bf16.gmra.mxu2 %v2424_v17  ;;  %v760_v25 = vadd.f32 %v759_v19, %v2396_v0  ;;  %1249 = vmatpush.bf16.msrb.mxu1 %v1891_v32 }
 0x1e2   :  { %v2377_v49 = vpack.c.b16 %v672_v41, %v671_v39  ;;  %v1888_v39 = vld [vmem:[%s2528_s14 + $0x18] sm:$0xff]  ;;  %v1879_v41 = vld [vmem:[%s2524_s15 + $0x10] sm:$0xff] }
 0x1e3   :  { %v768_v29 = vmax.f32 %v760_v25, 0.0  ;;  %1173 = vmatpush.bf16.msrb.mxu0 %v1881_v36 }
 0x1e4   :  { %761 = vmatmul.bf16.gmra.mxu3 %v2377_v49 }
 0x1e5   :  { %v987_v56 = vpop.f32.mrf.mxu2  ;;  %v771_v30 = vpack.c.bf16 %v768_v29, %v767_v24  ;;  %1250 = vmatpush.bf16.msrb.mxu1 %v1890_v35 }
 0x1e6   :  { %v988_v10 = vadd.f32 %v987_v56, %v2393_v62  ;;  %v791_v56 = vperm.slane %v789_v50, 0 }
 0x1e7   :  { %883 = vmatmul.bf16.vlgmr.msra.gmra.mxu0 %v771_v30  ;;  %902 = vmatmul.bf16.vlgmr.msra.gmra.mxu1 %v771_v30 }
 0x1e8   :  { %v997_v22 = vmax.f32 %v988_v10, 0.0  ;;  %1174 = vmatpush.bf16.msrb.mxu0 %v1880_v38 }
 0x1e9   :  { %1251 = vmatpush.bf16.msrb.mxu1 %v1889_v37 }
 0x1ec   :  { %1175 = vmatpush.bf16.msrb.mxu0 %v1879_v41 }
 0x1ed   :  { %v989_v16 = vpop.f32.mrf.mxu2  ;;  %1252 = vmatpush.bf16.msrb.mxu1 %v1888_v39 }
 0x1ee   :  { %v990_v18 = vadd.f32 %v989_v16, %v2393_v62 }
 0x1f0   :  { %v998_v23 = vmax.f32 %v990_v18, 0.0  ;;  %1176 = vmatpush.bf16.msrb.mxu0 %v1878_v44 }
 0x1f1   :  { %1253 = vmatpush.bf16.msrb.mxu1 %v1887_v42 }
 0x1f2   :  { %v1001_v28 = vpack.c.bf16 %v998_v23, %v997_v22 }
 0x1f4   :  { %1079 = vmatmul.bf16.vlgmr.msra.gmra.mxu3 %v1001_v28  ;;  %1177 = vmatpush.bf16.msrb.mxu0 %v1877_v46 }
 0x1f5   :  { %1254 = vmatpush.bf16.msrb.mxu1 %v1886_v45 }
 0x1f9   :  { %1255 = vmatpush.bf16.msrb.mxu1 %v1885_v47 }
 0x264   :  { %v992_v60 = vpop.f32.mrf.mxu2  ;;  %v884_v61 = vpop.f32.mrf.mxu0 }
 0x265   :  { %v885_v1 = vadd.f32 %v884_v61, %v791_v56  ;;  %v903_v2 = vpop.f32.mrf.mxu1  ;;  %v993_v5 = vadd.f32 %v992_v60, %v2393_v62 }
 0x266   :  { %v904_v3 = vadd.f32 %v903_v2, %v792_v57 }
 0x267   :  { %v762_v48 = vpop.f32.mrf.mxu3  ;;  %v999_v43 = vmax.f32 %v993_v5, 0.0 }
 0x268   :  { %v763_v51 = vadd.f32 %v762_v48, %v2396_v0  ;;  %v1090_v6 = vpack.c.bf16 %v904_v3, %v885_v1 }
 0x26a   :  { %v769_v58 = vmax.f32 %v763_v51, 0.0  ;;  %1092 = vst [vmem:[%s2535_s16] sm:$0xff] %v1090_v6 }
 0x26c   :  { %v886_v8 = vpop.f32.mrf.mxu0 }
 0x26d   :  { %v887_v10 = vadd.f32 %v886_v8, %v791_v56  ;;  %v905_v11 = vpop.f32.mrf.mxu1 }
 0x26e   :  { %v906_v13 = vadd.f32 %v905_v11, %v792_v57 }
 0x26f   :  { %v764_v52 = vpop.f32.mrf.mxu3 }
 0x270   :  { %v765_v53 = vadd.f32 %v764_v52, %v2396_v0  ;;  %v994_v0 = vpop.f32.mrf.mxu2  ;;  %v1091_v16 = vpack.c.bf16 %v906_v13, %v887_v10 }
 0x271   :  { %v995_v7 = vadd.f32 %v994_v0, %v2393_v62 }
 0x272   :  { %v770_v59 = vmax.f32 %v765_v53, 0.0  ;;  %1093 = vst [vmem:[%s2535_s16 + $0x8] sm:$0xff] %v1091_v16 }
 0x273   :  { %v1000_v12 = vmax.f32 %v995_v7, 0.0 }
 0x274   :  { %v772_v63 = vpack.c.bf16 %v770_v59, %v769_v58 }
 0x275   :  { %v1002_v15 = vpack.c.bf16 %v1000_v12, %v999_v43 }
 0x276   :  { %888 = vmatmul.bf16.gmra.mxu0 %v772_v63  ;;  %907 = vmatmul.bf16.gmra.mxu1 %v772_v63 }
 0x277   :  { %v1080_v4 = vpop.f32.mrf.mxu3  ;;  %1084 = vmatmul.bf16.gmra.mxu3 %v1002_v15 }
 0x278   :  { %v1081_v18 = vadd.f32 %v1903_v9, %v1080_v4 }
 0x27f   :  { %v1082_v14 = vpop.f32.mrf.mxu3 }
 0x280   :  { %v1083_v19 = vadd.f32 %v1903_v9, %v1082_v14 }
 0x282   :  { %v1896_v62 = vpack.c.bf16 %v1083_v19, %v1081_v18 }
 0x284   :  { %1897 = vst [vmem:[%s2536_s17] sm:$0xff] %v1896_v62  }
 0x286   :  { %1178 = vmatmul.bf16.vlgmr.msrb.gmra.mxu0 %v2424_v17  ;;  %1256 = vmatmul.bf16.vlgmr.msrb.gmra.mxu1 %v2377_v49 }
 0x2f3   :  { %v889_v20 = vpop.f32.mrf.mxu0  ;;  %v908_v21 = vpop.f32.mrf.mxu1 }
 0x2f4   :  { %v890_v22 = vadd.f32 %v889_v20, %v791_v56  ;;  %v909_v23 = vadd.f32 %v908_v21, %v792_v57 }
 0x2f6   :  { %v1094_v24 = vpack.c.bf16 %v909_v23, %v890_v22 }
 0x2f8   :  { %1096 = vst [vmem:[%s2537_s19] sm:$0xff] %v1094_v24 }
 0x2fa   :  { %v1085_v32 = vpop.f32.mrf.mxu3 }
 0x2fb   :  { %v891_v25 = vpop.f32.mrf.mxu0  ;;  %v910_v26 = vpop.f32.mrf.mxu1  ;;  %v1086_v38 = vadd.f32 %v1903_v9, %v1085_v32 }
 0x2fc   :  { %v892_v27 = vadd.f32 %v891_v25, %v791_v56  ;;  %v911_v28 = vadd.f32 %v910_v26, %v792_v57 }
 0x2fe   :  { %v1095_v29 = vpack.c.bf16 %v911_v28, %v892_v27 }
 0x300   :  { %1097 = vst [vmem:[%s2537_s19 + $0x8] sm:$0xff] %v1095_v29 }
 0x302   :  { %v1087_v42 = vpop.f32.mrf.mxu3 }
 0x303   :  { %v1179_v17 = vpop.f32.mrf.mxu0  ;;  %v1257_v49 = vpop.f32.mrf.mxu1  ;;  %v1088_v44 = vadd.f32 %v1903_v9, %v1087_v42 }
 0x304   :  { %v1270_v30 = vsub.f32 %v2232_v34, %v1257_v49  ;;  %v1262_v31 = vsub.f32 %v2267_v54, %v1179_v17  ;;  %v1278_v34 = vlaneseq }
 0x305   :  { %v1901_v47 = vpack.c.bf16 %v1088_v44, %v1086_v38 }
 0x306   :  { %v1272_v33 = vand.u32 2147483647, %v1270_v30  ;;  %v1264_v35 = vand.u32 2147483647, %v1262_v31  ;;  %v1279_v54 = vand.u32 127, %v1278_v34 }
 0x307   :  { %1902 = vst [vmem:[%s2538_s18] sm:$0xff] %v1901_v47  }
 0x308   :  { %1274 = vadd.xlane.f32.xlu1 %v1272_v33  ;;  %1266 = vadd.xlane.f32.xlu0 %v1264_v35  ;;  %vm1283_vm0 = vcmp.eq.s32.totalorder %v1279_v54, 1  ;;  %vm1280_vm1 = vcmp.eq.s32.totalorder %v1279_v54, 0 }
 0x30b   :  { %v1181_v36 = vpop.f32.mrf.mxu0  ;;  %v1259_v37 = vpop.f32.mrf.mxu1 }
 0x30c   :  { %v1263_v39 = vsub.f32 %v2269_v55, %v1181_v36  ;;  %v1271_v41 = vsub.f32 %v2246_v40, %v1259_v37 }
 0x30e   :  { %v1265_v45 = vand.u32 2147483647, %v1263_v39  ;;  %v1273_v46 = vand.u32 2147483647, %v1271_v41 }
 0x310   :  { %1276 = vadd.xlane.f32.xlu1 %v1273_v46  ;;  %1268 = vadd.xlane.f32.xlu0 %v1265_v45 }
 0x37b   :  { %v1275_v48 = vpop.xlane.xlu1 %1274  ;;  %v1267_v50 = vpop.xlane.xlu0 %1266 }
 0x37c   :  { %v1284_v55 = vsel %vm1283_vm0, %v1275_v48, 0.0  ;;  %v1281_v51 = vsel %vm1280_vm1, %v1267_v50, 0.0 }
 0x37d   :  { %v1286_v40 = vadd.f32 %v1284_v55, %v1281_v51 }
 0x37f   :  { %1288 = vst [vmem:[%s2539_s22] sm:$0xff] %v1286_v40 }
 0x383   :  { %v1277_v52 = vpop.xlane.xlu1 %1276  ;;  %v1269_v53 = vpop.xlane.xlu0 %1268 }
 0x384   :  { %v1285_v56 = vsel %vm1283_vm0, %v1277_v52, 0.0  ;;  %v1282_v57 = vsel %vm1280_vm1, %v1269_v53, 0.0 }
 0x385   :  { %v1287_v58 = vadd.f32 %v1285_v56, %v1282_v57 }
 0x387   :  { %1289 = vst [vmem:[%s2539_s22 + $0x8] sm:$0xff] %v1287_v58 }

</bundles_post_ra>
